<compile_context>
chip_gen: v7x
topology: tpu7x:2x2x1
jax: 0.10.0
libtpu: 0.0.40
codegen_flags: <defaults>
</compile_context>

<pallas_src>
import functools
import numpy as np
import jax
import jax.numpy as jnp
from jax.experimental import pallas as pl
from jax.experimental.pallas import tpu as pltpu


# ---------------- host-side parameter construction ----------------

def gaussian_blur_matrix(n: int, sigma: float) -> jnp.ndarray:
    # TODO(synk): exact boundary mode of smooth_gaussian unavailable; the blur
    # matrix renormalizes the truncated kernel at the edges.
    idx = np.arange(n, dtype=np.float32)
    d = idx[:, None] - idx[None, :]
    k = np.exp(-0.5 * (d / float(sigma)) ** 2)
    k = k / k.sum(axis=1, keepdims=True)
    return jnp.asarray(k, dtype=jnp.float32)


# ---------------- Pallas kernel 1: __init__-time precompute ----------------

def _precompute_kernel(img_ref, ky_ref, kxT_ref, maps_ref):
    """smooth_gaussian (separable blur, 2 MXU matmuls) then
    get_gradients_by_shifting (circular central differences via XLU rolls)."""
    img = img_ref[...]
    H, W = img.shape
    tmp = jnp.dot(ky_ref[...], img, preferred_element_type=jnp.float32)
    sm = jnp.dot(tmp, kxT_ref[...], preferred_element_type=jnp.float32)
    # circular central difference, identical to torch.roll-based shifting:
    #   g[i] = 0.5 * (v[i+1] - v[i-1])   with wrap-around
    gx = 0.5 * (pltpu.roll(sm, W - 1, 1) - pltpu.roll(sm, 1, 1))
    gy = 0.5 * (pltpu.roll(sm, H - 1, 0) - pltpu.roll(sm, 1, 0))
    maps_ref[0] = sm   # smoothed landscape (loss)
    maps_ref[1] = gx   # d/d(col) -> gradient for coords[0] (x)
    maps_ref[2] = gy   # d/d(row) -> gradient for coords[1] (y)


def precompute_landscape(image, sigma):
    """__init__-time work: blur + gradients.  Returns the (3, H, W) maps."""
    image = image.astype(jnp.float32)
    H, W = image.shape
    ky = gaussian_blur_matrix(H, sigma)
    kxT = gaussian_blur_matrix(W, sigma).T

    vmem = pl.BlockSpec(memory_space=pltpu.MemorySpace.VMEM)
    maps = pl.pallas_call(
        _precompute_kernel,
        out_shape=jax.ShapeDtypeStruct((3, H, W), jnp.float32),
        in_specs=[vmem, vmem, vmem],
        out_specs=vmem,
        # TODO(synk): for very large landscapes (notably v7x with 64 MiB VMEM)
        # tile this over row/col blocks or switch to a banded separable blur;
        # it runs once at __init__ so the untiled dense form is kept here.
        compiler_params=pltpu.CompilerParams(vmem_limit_bytes=32 * 1024 * 1024),
    )(image, ky, kxT)
    return maps


# ---------------- Pallas kernel 2: forward() / fused descent ----------------

def _descent_kernel(coords_ref, maps_ref, out_ref, *, hw, scale, lr, num_steps):
    """num_steps fused forward()+SGD steps with the maps resident in VMEM.

    Output row k (lane-dense, 128 wide):
      lane 0: loss at step-k coords
      lane 1: cx at step k (coords_history entry)
      lane 2: cy at step k
      lane 3: grad_x * scale  (what forward() adds to coords.grad[0])
      lane 4: grad_y * scale
    Row num_steps: lanes 0/1 hold the final (post-update) coords."""
    H, W = hw
    row_pos = jax.lax.broadcasted_iota(jnp.float32, (H, 1), 0)
    col_pos = jax.lax.broadcasted_iota(jnp.float32, (1, W), 1)
    lane = jax.lax.broadcasted_iota(jnp.int32, (1, 128), 1)

    one = jnp.ones((1, 1), jnp.float32)
    cx0 = coords_ref[0] * one
    cy0 = coords_ref[1] * one

    def step(k, carry):
        cx, cy = carry
        # TODO(synk): get_interpolated_value_torch source unavailable; uses
        # the align_corners-style pixel mapping (c + 1)/2 * (size - 1).
        px = jnp.clip((cx + 1.0) * 0.5 * (W - 1), 0.0, W - 1.0)
        py = jnp.clip((cy + 1.0) * 0.5 * (H - 1), 0.0, H - 1.0)
        x0 = jnp.floor(px)
        y0 = jnp.floor(py)
        x1 = jnp.minimum(x0 + 1.0, W - 1.0)
        y1 = jnp.minimum(y0 + 1.0, H - 1.0)
        wx = px - x0
        wy = py - y0

        # one bilinear weight mask shared by all three maps
        w_col = (jnp.where(col_pos == x0, 1.0 - wx, 0.0)
                 + jnp.where(col_pos == x1, wx, 0.0))          # (1, W)
        w_row = (jnp.where(row_pos == y0, 1.0 - wy, 0.0)
                 + jnp.where(row_pos == y1, wy, 0.0))          # (H, 1)
        w = w_row * w_col                                      # (H, W)

        loss = jnp.sum(maps_ref[0] * w, keepdims=True)         # (1, 1)
        gvx = jnp.sum(maps_ref[1] * w, keepdims=True)
        gvy = jnp.sum(maps_ref[2] * w, keepdims=True)

        # TODO(synk): out_of_bounds_hard source unavailable; approximated as
        # "if a coordinate leaves [-1, 1], its gradient becomes sign(coord)".
        ovx = ((cx < -1.0) | (cx > 1.0)).astype(jnp.float32)
        ovy = ((cy < -1.0) | (cy > 1.0)).astype(jnp.float32)
        gsx = ((1.0 - ovx) * gvx + ovx * jnp.sign(cx)) * scale
        gsy = ((1.0 - ovy) * gvy + ovy * jnp.sign(cy)) * scale

        rec = (jnp.where(lane == 0, loss, 0.0)
               + jnp.where(lane == 1, cx, 0.0)
               + jnp.where(lane == 2, cy, 0.0)
               + jnp.where(lane == 3, gsx, 0.0)
               + jnp.where(lane == 4, gsy, 0.0))               # (1, 128)
        out_ref[pl.ds(k, 1), :] = rec

        # TODO(synk): the optimizer lives outside the torch module; plain SGD
        # (coords -= lr * coords.grad) is the fused in-kernel update (lr=0
        # reproduces a pure forward()).
        return (cx - lr * gsx, cy - lr * gsy)

    cxf, cyf = jax.lax.fori_loop(0, num_steps, step, (cx0, cy0))
    out_ref[pl.ds(num_steps, 1), :] = (jnp.where(lane == 0, cxf, 0.0)
                                       + jnp.where(lane == 1, cyf, 0.0))


def _descent_call(maps, coords, scale, lr, num_steps):
    _, H, W = maps.shape
    kernel = functools.partial(
        _descent_kernel, hw=(H, W), scale=float(scale), lr=float(lr),
        num_steps=int(num_steps))
    return pl.pallas_call(
        kernel,
        out_shape=jax.ShapeDtypeStruct((int(num_steps) + 1, 128), jnp.float32),
        in_specs=[pl.BlockSpec(memory_space=pltpu.MemorySpace.SMEM),   # coords
                  pl.BlockSpec(memory_space=pltpu.MemorySpace.VMEM)],  # maps
        out_specs=pl.BlockSpec(memory_space=pltpu.MemorySpace.VMEM),
        compiler_params=pltpu.CompilerParams(vmem_limit_bytes=32 * 1024 * 1024),
    )(coords.astype(jnp.float32), maps)


def image_descent_forward(maps, coords, scale):
    """forward(): loss at `coords` plus the gradient that would be accumulated
    into coords.grad (already multiplied by `scale`)."""
    out = _descent_call(maps, coords, scale, lr=0.0, num_steps=1)
    return out[0, 0], out[0, 3:5]


def image_descent_run(maps, coords, scale, lr, num_steps):
    """Fused descent: `num_steps` forward() + SGD updates in ONE pallas_call.
    Returns (loss_history, coords_history, grad_history, final_coords)."""
    out = _descent_call(maps, coords, scale, lr, num_steps)
    return (out[:num_steps, 0], out[:num_steps, 1:3],
            out[:num_steps, 3:5], out[num_steps, 0:2])


# ---------------- pure-numpy reference for the checks ----------------

def _ref_bilerp(arr, cx, cy):
    Hh, Ww = arr.shape
    px = float(np.clip((cx + 1.0) * 0.5 * (Ww - 1), 0.0, Ww - 1))
    py = float(np.clip((cy + 1.0) * 0.5 * (Hh - 1), 0.0, Hh - 1))
    x0 = int(np.floor(px)); y0 = int(np.floor(py))
    x1 = min(x0 + 1, Ww - 1); y1 = min(y0 + 1, Hh - 1)
    wx = px - x0; wy = py - y0
    return ((1 - wy) * ((1 - wx) * arr[y0, x0] + wx * arr[y0, x1]) +
            wy * ((1 - wx) * arr[y1, x0] + wx * arr[y1, x1]))


if __name__ == "__main__":
    H, W = 64, 128          # small, lane/MXU-friendly landscape
    scale = 100.0
    smooth = 2

    key = jax.random.PRNGKey(0)
    # "image already loaded, black & white, normalized to [0, 1]"
    image = jax.random.uniform(key, (H, W), dtype=jnp.float32)

    # __init__-time preprocessing (Pallas kernel 1)
    maps = precompute_landscape(image, smooth)
    maps = jax.block_until_ready(maps)

    maps_np = np.asarray(maps)
    sm_k, gx_k, gy_k = maps_np[0], maps_np[1], maps_np[2]

    # --- check precompute against numpy ---
    img_np = np.asarray(image, dtype=np.float64)
    ky_np = np.asarray(gaussian_blur_matrix(H, smooth), dtype=np.float64)
    kx_np = np.asarray(gaussian_blur_matrix(W, smooth), dtype=np.float64)
    sm_ref = ky_np @ img_np @ kx_np.T
    np.testing.assert_allclose(sm_k, sm_ref, rtol=2e-2, atol=1e-3)
    gx_ref = 0.5 * (np.roll(sm_k, -1, axis=1) - np.roll(sm_k, 1, axis=1))
    gy_ref = 0.5 * (np.roll(sm_k, -1, axis=0) - np.roll(sm_k, 1, axis=0))
    np.testing.assert_allclose(gx_k, gx_ref, rtol=1e-5, atol=1e-6)
    np.testing.assert_allclose(gy_k, gy_ref, rtol=1e-5, atol=1e-6)

    # --- single-step forward() (Pallas kernel 2), incl. edge / OOB cases ---
    def ref_forward(cx, cy):
        loss = _ref_bilerp(sm_k, cx, cy)
        gx = np.sign(cx) if (cx < -1.0 or cx > 1.0) else _ref_bilerp(gx_k, cx, cy)
        gy = np.sign(cy) if (cy < -1.0 or cy > 1.0) else _ref_bilerp(gy_k, cx, cy)
        return loss, np.array([gx, gy], dtype=np.float32) * scale

    for test_coords in ([0.25, -0.4], [-0.97, 0.93], [1.5, -0.3]):
        c = jnp.array(test_coords, dtype=jnp.float32)
        loss, grad = image_descent_forward(maps, c, scale)
        loss = jax.block_until_ready(loss)
        grad = jax.block_until_ready(grad)
        ref_loss, ref_grad = ref_forward(test_coords[0], test_coords[1])
        np.testing.assert_allclose(float(loss), ref_loss, rtol=1e-4, atol=1e-5)
        np.testing.assert_allclose(np.asarray(grad), ref_grad, rtol=1e-4, atol=1e-4)

    # --- fused multi-step descent: K steps in a single pallas_call ---
    K, lr = 25, 2e-3
    start = [0.25, -0.4]
    losses, traj, grads, final_c = image_descent_run(
        maps, jnp.array(start, dtype=jnp.float32), scale, lr, K)
    losses = jax.block_until_ready(losses)
    traj = jax.block_until_ready(traj)
    grads = jax.block_until_ready(grads)
    final_c = jax.block_until_ready(final_c)

    cx, cy = np.float32(start[0]), np.float32(start[1])
    ref_losses, ref_traj = [], []
    for _ in range(K):
        ref_traj.append((cx, cy))
        l, g = ref_forward(float(cx), float(cy))
        ref_losses.append(l)
        cx = np.float32(cx - lr * g[0])
        cy = np.float32(cy - lr * g[1])
    np.testing.assert_allclose(np.asarray(losses),
                               np.asarray(ref_losses, dtype=np.float32),
                               rtol=2e-3, atol=1e-3)
    np.testing.assert_allclose(np.asarray(traj),
                               np.asarray(ref_traj, dtype=np.float32),
                               rtol=2e-3, atol=1e-3)
    np.testing.assert_allclose(np.asarray(final_c),
                               np.array([cx, cy], dtype=np.float32),
                               rtol=2e-3, atol=1e-3)

    print("KERNEL_OK")
</pallas_src>

<mosaic_0001>
module attributes {stable_mosaic.version = 11 : i64} {
  func.func @_precompute_kernel(%arg0: memref<64x128xf32, #tpu.memory_space<vmem>>, %arg1: memref<64x64xf32, #tpu.memory_space<vmem>>, %arg2: memref<128x128xf32, #tpu.memory_space<vmem>>, %arg3: memref<3x64x128xf32, #tpu.memory_space<vmem>>) attributes {dimension_semantics = [], scalar_prefetch = 0 : i64, scratch_operands = 0 : i64, tpu.core_type = #tpu.core_type<tc>} {
    %c0 = arith.constant 0 : index
    %c0_0 = arith.constant 0 : index
    %0 = vector.load %arg0[%c0, %c0_0] : memref<64x128xf32, #tpu.memory_space<vmem>>, vector<64x128xf32>
    %c0_1 = arith.constant 0 : index
    %c0_2 = arith.constant 0 : index
    %1 = vector.load %arg1[%c0_1, %c0_2] : memref<64x64xf32, #tpu.memory_space<vmem>>, vector<64x64xf32>
    %cst = arith.constant dense<0.000000e+00> : vector<64x128xf32>
    %2 = tpu.matmul %1, %0, %cst {dimension_numbers = #tpu.dot_dimension_numbers<[1], [0], [0], [1], [0, 0, 1, 1], [], []>} : vector<64x64xf32>, vector<64x128xf32>, vector<64x128xf32> -> vector<64x128xf32>
    %c0_3 = arith.constant 0 : index
    %c0_4 = arith.constant 0 : index
    %3 = vector.load %arg2[%c0_3, %c0_4] : memref<128x128xf32, #tpu.memory_space<vmem>>, vector<128x128xf32>
    %cst_5 = arith.constant dense<0.000000e+00> : vector<64x128xf32>
    %4 = tpu.matmul %2, %3, %cst_5 {dimension_numbers = #tpu.dot_dimension_numbers<[1], [0], [0], [1], [0, 0, 1, 1], [], []>} : vector<64x128xf32>, vector<128x128xf32>, vector<64x128xf32> -> vector<64x128xf32>
    %c127_i32 = arith.constant 127 : i32
    %5 = tpu.dynamic_rotate %4 by %c127_i32 dim 1 : vector<64x128xf32>, i32 -> vector<64x128xf32>
    %c1_i32 = arith.constant 1 : i32
    %6 = tpu.dynamic_rotate %4 by %c1_i32 dim 1 : vector<64x128xf32>, i32 -> vector<64x128xf32>
    %7 = arith.subf %5, %6 : vector<64x128xf32>
    %cst_6 = arith.constant 5.000000e-01 : f32
    %8 = vector.broadcast %cst_6 : f32 to vector<64x128xf32>
    %9 = arith.mulf %8, %7 : vector<64x128xf32>
    %c63_i32 = arith.constant 63 : i32
    %10 = tpu.dynamic_rotate %4 by %c63_i32 dim 0 : vector<64x128xf32>, i32 -> vector<64x128xf32>
    %c1_i32_7 = arith.constant 1 : i32
    %11 = tpu.dynamic_rotate %4 by %c1_i32_7 dim 0 : vector<64x128xf32>, i32 -> vector<64x128xf32>
    %12 = arith.subf %10, %11 : vector<64x128xf32>
    %cst_8 = arith.constant 5.000000e-01 : f32
    %13 = vector.broadcast %cst_8 : f32 to vector<64x128xf32>
    %14 = arith.mulf %13, %12 : vector<64x128xf32>
    %c0_9 = arith.constant 0 : index
    %c0_10 = arith.constant 0 : index
    %c0_11 = arith.constant 0 : index
    %15 = vector.load %arg3[%c0_9, %c0_10, %c0_11] : memref<3x64x128xf32, #tpu.memory_space<vmem>>, vector<1x64x128xf32>
    %16 = vector.shape_cast %15 : vector<1x64x128xf32> to vector<64x128xf32>
    %17 = vector.shape_cast %4 : vector<64x128xf32> to vector<1x64x128xf32>
    tpu.vector_store %arg3[%c0_9, %c0_10, %c0_11], %17 {strides = array<i32>} : memref<3x64x128xf32, #tpu.memory_space<vmem>>, vector<1x64x128xf32>,
    %c1 = arith.constant 1 : index
    %c0_12 = arith.constant 0 : index
    %c0_13 = arith.constant 0 : index
    %18 = vector.load %arg3[%c1, %c0_12, %c0_13] : memref<3x64x128xf32, #tpu.memory_space<vmem>>, vector<1x64x128xf32>
    %19 = vector.shape_cast %18 : vector<1x64x128xf32> to vector<64x128xf32>
    %20 = vector.shape_cast %9 : vector<64x128xf32> to vector<1x64x128xf32>
    tpu.vector_store %arg3[%c1, %c0_12, %c0_13], %20 {strides = array<i32>} : memref<3x64x128xf32, #tpu.memory_space<vmem>>, vector<1x64x128xf32>,
    %c2 = arith.constant 2 : index
    %c0_14 = arith.constant 0 : index
    %c0_15 = arith.constant 0 : index
    %21 = vector.load %arg3[%c2, %c0_14, %c0_15] : memref<3x64x128xf32, #tpu.memory_space<vmem>>, vector<1x64x128xf32>
    %22 = vector.shape_cast %21 : vector<1x64x128xf32> to vector<64x128xf32>
    %23 = vector.shape_cast %14 : vector<64x128xf32> to vector<1x64x128xf32>
    tpu.vector_store %arg3[%c2, %c0_14, %c0_15], %23 {strides = array<i32>} : memref<3x64x128xf32, #tpu.memory_space<vmem>>, vector<1x64x128xf32>,
    return
  }
}

</mosaic_0001>

<bundles_post_ra>
// kernel: tpu_custom_call.1
= control target key start
LH: loop header
LB: loop body
LE: loop exit
PB: predicated region body
PF: predicated region fallthrough
CT: control target
= control target key end

     0   :  { %8 = vsyncpa [#allocation3], 0  ;;  %s895_s0 = inlined_call_operand.hbm [shape: f32[64,128], index: 0, kind: input, shape index: {}]   ;;  %s896_s1 = inlined_call_operand.hbm [shape: f32[64,64], index: 1, kind: input, shape index: {}]   ;;  %s897_s2 = inlined_call_operand.hbm [shape: f32[128,128], index: 2, kind: input, shape index: {}]   ;;  %s898_s3 = inlined_call_operand.hbm [shape: f32[3,64,128], index: 3, kind: output, shape index: {}]  }
   0x1   :  { %9 = vsyncpa [#allocation6], 0 }
   0x2   :  { %10 = vsyncpa [#allocation4], 0  ;;  %s737_s12 = smov [#allocation5]   ;;  %s738_s14 = smov [#allocation2]  }
   0x3   :  { %s28_s13 = sshll.u32 %s737_s12, 4  ;;  %s16_s15 = sshll.u32 %s738_s14, 4  ;;  %s29_s13 = int_to_ptr.vmem [resolvable:$true] %s28_s13  ;;  %s765_s15 = int_to_ptr.vmem [resolvable:$true] %s16_s15 }
   0x4   :  { %s643_s18 = scalar_lea.hbm %s896_s1, 1024 }
   0x5   :  { %p644_p0 = scmp.ne.s32.totalorder %s896_s1, %s643_s18  ;;  %p647_p1 = scmp.lt.u32.totalorder %s643_s18, %s896_s1 }
   0x7   :  { %p649_p2 = pnand %p647_p1, %p644_p0 }
   0x9   :  { %652 = shalt.err (!%p649_p2)
}
   0xa   :  { %s653_s23 = scalar_lea.vmem %s29_s13, 1024  ;;  %p658_p4 = scmp.lt.s32.totalorder %s29_s13, %s29_s13 }
   0xb   :  { %p654_p3 = scmp.ne.s32.totalorder %s29_s13, %s653_s23  ;;  %p659_p5 = scmp.lt.s32.totalorder %s653_s23, %s653_s23 }
   0xd   :  { %p660_p6 = por %p659_p5, %p658_p4 }
   0xf   :  { %p661_p7 = pnand %p660_p6, %p654_p3 }
  0x11   :  { %664 = shalt.err (!%p661_p7)
}
  0x12   :  { %s739_s24 = smov 128   ;;  %s740_s25 = smov 8  }
  0x13   :  { %34 = dma.hbm_to_vmem [thread:$0]  %s896_s1, 1024, %s29_s13, [#allocation6], %s739_s24, %s739_s24, %s740_s25  }
  0x14   :  { %s665_s30 = scalar_lea.hbm %s895_s0, 1024 }
  0x15   :  { %p666_p8 = scmp.ne.s32.totalorder %s895_s0, %s665_s30  ;;  %p669_p9 = scmp.lt.u32.totalorder %s665_s30, %s895_s0 }
  0x17   :  { %p671_p10 = pnand %p669_p9, %p666_p8 }
  0x19   :  { %674 = shalt.err (!%p671_p10)
}
  0x1a   :  { %s675_s8 = scalar_lea.vmem %s765_s15, 1024  ;;  %p680_p12 = scmp.lt.s32.totalorder %s765_s15, %s765_s15 }
  0x1b   :  { %p676_p11 = scmp.ne.s32.totalorder %s765_s15, %s675_s8  ;;  %p681_p13 = scmp.lt.s32.totalorder %s675_s8, %s675_s8 }
  0x1d   :  { %p682_p0 = por %p681_p13, %p680_p12 }
  0x1f   :  { %p683_p1 = pnand %p682_p0, %p676_p11 }
  0x21   :  { %686 = shalt.err (!%p683_p1)
}
  0x22   :  { %22 = dma.hbm_to_vmem [thread:$0]  %s895_s0, 1024, %s765_s15, [#allocation3], %s739_s24, %s739_s24, %s740_s25  }
  0x23   :  { %s741_s10 = smov [#allocation7]   ;;  %s687_s14 = scalar_lea.hbm %s897_s2, 2048 }
  0x24   :  { %s40_s11 = sshll.u32 %s741_s10, 4  ;;  %p688_p2 = scmp.ne.s32.totalorder %s897_s2, %s687_s14  ;;  %s41_s11 = int_to_ptr.vmem [resolvable:$true] %s40_s11 }
  0x25   :  { %p691_p3 = scmp.lt.u32.totalorder %s687_s14, %s897_s2 }
  0x27   :  { %p693_p4 = pnand %p691_p3, %p688_p2 }
  0x29   :  { %696 = shalt.err (!%p693_p4)
}
  0x2a   :  { %s697_s20 = scalar_lea.vmem %s41_s11, 2048  ;;  %p702_p6 = scmp.lt.s32.totalorder %s41_s11, %s41_s11 }
  0x2b   :  { %p698_p5 = scmp.ne.s32.totalorder %s41_s11, %s697_s20  ;;  %p703_p7 = scmp.lt.s32.totalorder %s697_s20, %s697_s20 }
  0x2d   :  { %p704_p8 = por %p703_p7, %p702_p6 }
  0x2f   :  { %p705_p9 = pnand %p704_p8, %p698_p5 }
  0x31   :  { %708 = shalt.err (!%p705_p9)
}
  0x32   :  { %46 = dma.hbm_to_vmem [thread:$0]  %s897_s2, 2048, %s41_s11, [#allocation6], %s739_s24, %s739_s24, %s740_s25  }
  0x33   :  { %731 = dma.done.wait [#allocation3], 1024  }
  0x34   :  { %732 = vsyncadd [#allocation3], 4294966272 }
  0x35   :  { %733 = dma.done.wait [#allocation6], 3072  }
  0x36   :  { %734 = vsyncadd [#allocation6], 4294964224  ;;  %v56_v0 = vld [vmem:[#allocation2] sm:$0xff]  ;;  %v57_v1 = vld [vmem:[#allocation2 + $0x8] sm:$0xff]  ;;  %vm72_vm0 = vcmask 523264   ;;  %v379_v52 = vlaneseq  ;;  %s742_s2 = smov 1  }
  0x37   :  { %v58_v2 = vld [vmem:[#allocation2 + $0x10] sm:$0xff]  ;;  %v587_v3 = vpack.c.bf16 %v57_v1, %v56_v0  ;;  %v59_v4 = vld [vmem:[#allocation2 + $0x18] sm:$0xff]  ;;  %v60_v6 = vld [vmem:[#allocation2 + $0x20] sm:$0xff]  ;;  %s743_s21 = smov 127   ;;  %s744_s22 = smov [#allocation8]  }
  0x38   :  { %v591_v5 = vpack.c.bf16 %v59_v4, %v58_v2  ;;  %v61_v7 = vld [vmem:[#allocation2 + $0x28] sm:$0xff]  ;;  %v64_v8 = vld [vmem:[#allocation5] sm:$0xff]  ;;  %v62_v10 = vld [vmem:[#allocation2 + $0x30] sm:$0xff]  ;;  %v825_v53 = vshrl.u32 %v379_v52, 7  ;;  %s454_s23 = sshll.u32 %s744_s22, 4  ;;  %s455_s23 = int_to_ptr.vmem [resolvable:$true] %s454_s23 }
  0x39   :  { %588 = vmatprep.subr.bf16.mxu0 %v587_v3  ;;  %531 = vmatprep.mubr.msk.f32.mxu0 %vm72_vm0, %v64_v8  ;;  %v595_v9 = vpack.c.bf16 %v61_v7, %v60_v6  ;;  %v202_v11 = vld [vmem:[#allocation7] sm:$0xff]  ;;  %v203_v12 = vld [vmem:[#allocation7 + $0x8] sm:$0xff]  ;;  %v63_v13 = vld [vmem:[#allocation2 + $0x38] sm:$0xff]  ;;  %s709_s26 = scalar_lea.vmem %s455_s23, 3072  ;;  %p714_p11 = scmp.lt.s32.totalorder %s455_s23, %s455_s23 }
  0x3a   :  { %590 = vmatpush3.bf16.msra.mxu0 %v587_v3  ;;  %v603_v14 = vpack.c.bf16 %v203_v12, %v202_v11  ;;  %v204_v15 = vld [vmem:[#allocation7 + $0x10] sm:$0xff]  ;;  %v205_v16 = vld [vmem:[#allocation7 + $0x18] sm:$0xff]  ;;  %v206_v18 = vld [vmem:[#allocation7 + $0x20] sm:$0xff]  ;;  %v599_v20 = vpack.c.bf16 %v63_v13, %v62_v10  ;;  %vm381_vm1 = vcmp.lt.s32.totalorder %v825_v53, 7  ;;  %vm398_vm2 = vcmp.lt.s32.totalorder %v825_v53, 1  ;;  %p710_p10 = scmp.ne.s32.totalorder %s455_s23, %s709_s26  ;;  %p715_p12 = scmp.lt.s32.totalorder %s709_s26, %s709_s26 }
  0x3b   :  { %592 = vmatprep.subr.bf16.mxu0 %v591_v5  ;;  %v607_v17 = vpack.c.bf16 %v205_v16, %v204_v15  ;;  %v207_v19 = vld [vmem:[#allocation7 + $0x28] sm:$0xff]  ;;  %v208_v22 = vld [vmem:[#allocation7 + $0x30] sm:$0xff]  ;;  %v209_v23 = vld [vmem:[#allocation7 + $0x38] sm:$0xff] }
  0x3c   :  { %604 = vmatprep.subr.bf16.mxu1 %v603_v14  ;;  %v611_v21 = vpack.c.bf16 %v207_v19, %v206_v18  ;;  %v615_v24 = vpack.c.bf16 %v209_v23, %v208_v22  ;;  %v210_v25 = vld [vmem:[#allocation7 + $0x40] sm:$0xff]  ;;  %v211_v26 = vld [vmem:[#allocation7 + $0x48] sm:$0xff]  ;;  %v66_v28 = vld [vmem:[#allocation5 + $0x10] sm:$0xff]  ;;  %p716_p13 = por %p715_p12, %p714_p11 }
  0x3d   :  { %606 = vmatpush3.bf16.msra.mxu1 %v603_v14  ;;  %v65_v27 = vld [vmem:[#allocation5 + $0x8] sm:$0xff]  ;;  %v619_v29 = vpack.c.bf16 %v211_v26, %v210_v25  ;;  %v212_v30 = vld [vmem:[#allocation7 + $0x50] sm:$0xff]  ;;  %v213_v31 = vld [vmem:[#allocation7 + $0x58] sm:$0xff] }
  0x3e   :  { %594 = vmatpush3.bf16.msra.mxu0 %v591_v5  ;;  %608 = vmatprep.subr.bf16.mxu1 %v607_v17  ;;  %v67_v32 = vld [vmem:[#allocation5 + $0x18] sm:$0xff]  ;;  %v68_v33 = vld [vmem:[#allocation5 + $0x20] sm:$0xff]  ;;  %v623_v34 = vpack.c.bf16 %v213_v31, %v212_v30  ;;  %v215_v36 = vld [vmem:[#allocation7 + $0x68] sm:$0xff]  ;;  %p717_p0 = pnand %p716_p13, %p710_p10 }
  0x3f   :  { %596 = vmatprep.subr.bf16.mxu0 %v595_v9  ;;  %v214_v35 = vld [vmem:[#allocation7 + $0x60] sm:$0xff]  ;;  %v69_v37 = vld [vmem:[#allocation5 + $0x28] sm:$0xff]  ;;  %v70_v38 = vld [vmem:[#allocation5 + $0x30] sm:$0xff] }
  0x40   :  { %v627_v39 = vpack.c.bf16 %v215_v36, %v214_v35  ;;  %v216_v40 = vld [vmem:[#allocation7 + $0x70] sm:$0xff]  ;;  %v217_v41 = vld [vmem:[#allocation7 + $0x78] sm:$0xff] }
  0x41   :  { %610 = vmatpush3.bf16.msra.mxu1 %v607_v17  ;;  %v71_v42 = vld [vmem:[#allocation5 + $0x38] sm:$0xff]  ;;  %v631_v43 = vpack.c.bf16 %v217_v41, %v216_v40 }
  0x42   :  { %598 = vmatpush3.bf16.msra.mxu0 %v595_v9  ;;  %612 = vmatprep.subr.bf16.mxu1 %v611_v21 }
  0x43   :  { %600 = vmatprep.subr.bf16.mxu0 %v599_v20 }
  0x45   :  { %614 = vmatpush3.bf16.msra.mxu1 %v611_v21 }
  0x46   :  { %602 = vmatpush3.bf16.msra.mxu0 %v599_v20  ;;  %616 = vmatprep.subr.bf16.mxu1 %v615_v24 }
  0x49   :  { %532 = vmatmul.mubr.msk.f32.vlgmr.msra.gmra.mrb[0].mxu0 %vm72_vm0, %v65_v27  ;;  %618 = vmatpush3.bf16.msra.mxu1 %v615_v24 }
  0x4a   :  { %534 = vmatprep.mubr.msk.f32.mxu0 %vm72_vm0, %v66_v28  ;;  %620 = vmatprep.subr.bf16.mxu1 %v619_v29 }
  0x4d   :  { %535 = vmatmul.mubr.msk.f32.gmra.mrb[2].mxu0 %vm72_vm0, %v67_v32  ;;  %622 = vmatpush3.bf16.msra.mxu1 %v619_v29 }
  0x4e   :  { %537 = vmatprep.mubr.msk.f32.mxu0 %vm72_vm0, %v68_v33  ;;  %624 = vmatprep.subr.bf16.mxu1 %v623_v34 }
  0x51   :  { %538 = vmatmul.mubr.msk.f32.gmra.mrb[4].mxu0 %vm72_vm0, %v69_v37  ;;  %626 = vmatpush3.bf16.msra.mxu1 %v623_v34 }
  0x52   :  { %540 = vmatprep.mubr.msk.f32.mxu0 %vm72_vm0, %v70_v38  ;;  %628 = vmatprep.subr.bf16.mxu1 %v627_v39 }
  0x55   :  { %541 = vmatmul.mubr.msk.f32.gmra.mrb[6].mxu0 %vm72_vm0, %v71_v42  ;;  %630 = vmatpush3.bf16.msra.mxu1 %v627_v39 }
  0x56   :  { %632 = vmatprep.subr.bf16.mxu1 %v631_v43 }
  0x59   :  { %634 = vmatpush3.bf16.msra.mxu1 %v631_v43 }
 0x11c   :  { %v533_v44 = vpop.f32.mrb[0].mxu0 }
 0x11d   :  { %v163_v45 = vpop.f32.mrb[1].mxu0 }
 0x11e   :  { %575 = vmatprep.mubr.f32.mxu1 %v163_v45 }
 0x11f   :  { %576 = vmatmul.mubr.f32.vlgmr.msra.gmra.mrb[0].mxu1 %v533_v44 }
 0x120   :  { %v536_v46 = vpop.f32.mrb[2].mxu0 }
 0x121   :  { %v173_v47 = vpop.f32.mrb[3].mxu0 }
 0x122   :  { %578 = vmatprep.mubr.f32.mxu1 %v173_v47 }
 0x123   :  { %579 = vmatmul.mubr.f32.gmra.mrb[2].mxu1 %v536_v46 }
 0x124   :  { %v539_v48 = vpop.f32.mrb[4].mxu0 }
 0x125   :  { %v183_v49 = vpop.f32.mrb[5].mxu0 }
 0x126   :  { %581 = vmatprep.mubr.f32.mxu1 %v183_v49 }
 0x127   :  { %582 = vmatmul.mubr.f32.gmra.mrb[4].mxu1 %v539_v48 }
 0x128   :  { %v542_v50 = vpop.f32.mrb[6].mxu0 }
 0x129   :  { %v193_v51 = vpop.f32.mrb[7].mxu0 }
 0x12a   :  { %584 = vmatprep.mubr.f32.mxu1 %v193_v51 }
 0x12b   :  { %585 = vmatmul.mubr.f32.gmra.mrb[6].mxu1 %v542_v50 }
 0x1f2   :  { %v577_v54 = vpop.f32.mrb[0].mxu1 }
 0x1f3   :  { %v372_v55 = vrot.slane %v577_v54, 1  ;;  %v391_v56 = vrot.slane %v577_v54, 7  ;;  %424 = vst [vmem:[#allocation8 + $0x8] sm:$0xff] %v577_v54  ;;  %341 = vrot.lane.b32.xlu1 %v577_v54, %s742_s2  ;;  %325 = vrot.lane.b32.xlu0 %v577_v54, %s743_s21  ;;  %v284_v57 = vpop.f32.mrb[1].mxu1 }
 0x1f4   :  { %v371_v58 = vrot.slane %v284_v57, 1  ;;  %v390_v59 = vrot.slane %v284_v57, 7  ;;  %423 = vst [vmem:[#allocation8] sm:$0xff] %v284_v57 }
 0x1f6   :  { %v833_v60 = vsel %vm381_vm1, %v371_v58, %v372_v55  ;;  %v405_v61 = vsel %vm398_vm2, %v390_v59, %v391_v56  ;;  %v580_v62 = vpop.f32.mrb[2].mxu1 }
 0x1f7   :  { %v374_v63 = vrot.slane %v580_v62, 1  ;;  %v393_v0 = vrot.slane %v580_v62, 7  ;;  %426 = vst [vmem:[#allocation8 + $0x18] sm:$0xff] %v580_v62  ;;  %323 = vrot.lane.b32.xlu0 %v284_v57, %s743_s21  ;;  %329 = vrot.lane.b32.xlu1 %v580_v62, %s743_s21  ;;  %v294_v1 = vpop.f32.mrb[3].mxu1 }
 0x1f8   :  { %v373_v2 = vrot.slane %v294_v1, 1  ;;  %v392_v3 = vrot.slane %v294_v1, 7  ;;  %425 = vst [vmem:[#allocation8 + $0x10] sm:$0xff] %v294_v1 }
 0x1fa   :  { %v386_v4 = vsel %vm381_vm1, %v373_v2, %v374_v63  ;;  %v387_v5 = vsel %vm381_vm1, %v372_v55, %v373_v2  ;;  %v403_v6 = vsel %vm398_vm2, %v392_v3, %v393_v0  ;;  %v404_v7 = vsel %vm398_vm2, %v391_v56, %v392_v3  ;;  %v583_v8 = vpop.f32.mrb[4].mxu1 }
 0x1fb   :  { %v408_v9 = vsub.f32 %v387_v5, %v405_v61  ;;  %v409_v10 = vsub.f32 %v386_v4, %v404_v7  ;;  %v376_v11 = vrot.slane %v583_v8, 1  ;;  %v395_v12 = vrot.slane %v583_v8, 7  ;;  %428 = vst [vmem:[#allocation8 + $0x28] sm:$0xff] %v583_v8  ;;  %339 = vrot.lane.b32.xlu0 %v284_v57, %s742_s2  ;;  %345 = vrot.lane.b32.xlu1 %v580_v62, %s742_s2  ;;  %v304_v13 = vpop.f32.mrb[5].mxu1 }
 0x1fc   :  { %v375_v14 = vrot.slane %v304_v13, 1  ;;  %v394_v15 = vrot.slane %v304_v13, 7  ;;  %427 = vst [vmem:[#allocation8 + $0x20] sm:$0xff] %v304_v13 }
 0x1fd   :  { %v416_v16 = vmul.f32 0.5, %v408_v9  ;;  %v417_v17 = vmul.f32 0.5, %v409_v10 }
 0x1fe   :  { %v384_v18 = vsel %vm381_vm1, %v375_v14, %v376_v11  ;;  %v385_v19 = vsel %vm381_vm1, %v374_v63, %v375_v14  ;;  %v402_v20 = vsel %vm398_vm2, %v393_v0, %v394_v15  ;;  %v586_v21 = vpop.f32.mrb[6].mxu1  ;;  %v401_v22 = vsel %vm398_vm2, %v394_v15, %v395_v12 }
 0x1ff   :  { %442 = vst [vmem:[#allocation8 + $0x88] sm:$0xff] %v416_v16  ;;  %443 = vst [vmem:[#allocation8 + $0x90] sm:$0xff] %v417_v17  ;;  %v410_v23 = vsub.f32 %v385_v19, %v403_v6  ;;  %v411_v24 = vsub.f32 %v384_v18, %v402_v20  ;;  %v378_v25 = vrot.slane %v586_v21, 1  ;;  %v397_v26 = vrot.slane %v586_v21, 7  ;;  %343 = vrot.lane.b32.xlu0 %v294_v1, %s742_s2  ;;  %v314_v27 = vpop.f32.mrb[7].mxu1 }
 0x200   :  { %430 = vst [vmem:[#allocation8 + $0x38] sm:$0xff] %v586_v21  ;;  %327 = vrot.lane.b32.xlu1 %v294_v1, %s743_s21  ;;  %v377_v28 = vrot.slane %v314_v27, 1  ;;  %v396_v29 = vrot.slane %v314_v27, 7  ;;  %429 = vst [vmem:[#allocation8 + $0x30] sm:$0xff] %v314_v27 }
 0x201   :  { %v418_v30 = vmul.f32 0.5, %v410_v23  ;;  %v419_v31 = vmul.f32 0.5, %v411_v24  ;;  %v406_v32 = vsel %vm398_vm2, %v397_v26, %v390_v59  ;;  %v389_v33 = vsel %vm381_vm1, %v378_v25, %v371_v58 }
 0x202   :  { %v407_v34 = vsub.f32 %v833_v60, %v406_v32  ;;  %v382_v35 = vsel %vm381_vm1, %v377_v28, %v378_v25  ;;  %v383_v36 = vsel %vm381_vm1, %v376_v11, %v377_v28  ;;  %v399_v37 = vsel %vm398_vm2, %v396_v29, %v397_v26 }
 0x203   :  { %444 = vst [vmem:[#allocation8 + $0x98] sm:$0xff] %v418_v30  ;;  %445 = vst [vmem:[#allocation8 + $0xa0] sm:$0xff] %v419_v31  ;;  %v400_v38 = vsel %vm398_vm2, %v395_v12, %v396_v29  ;;  %v412_v39 = vsub.f32 %v383_v36, %v401_v22  ;;  %v414_v40 = vsub.f32 %v389_v33, %v399_v37  ;;  %331 = vrot.lane.b32.xlu0 %v304_v13, %s743_s21 }
 0x204   :  { %333 = vrot.lane.b32.xlu1 %v583_v8, %s743_s21  ;;  %v415_v41 = vmul.f32 0.5, %v407_v34  ;;  %v413_v42 = vsub.f32 %v382_v35, %v400_v38 }
 0x205   :  { %v420_v43 = vmul.f32 0.5, %v412_v39  ;;  %v422_v44 = vmul.f32 0.5, %v414_v40 }
 0x206   :  { %441 = vst [vmem:[#allocation8 + $0x80] sm:$0xff] %v415_v41  ;;  %v421_v45 = vmul.f32 0.5, %v413_v42 }
 0x207   :  { %446 = vst [vmem:[#allocation8 + $0xa8] sm:$0xff] %v420_v43  ;;  %448 = vst [vmem:[#allocation8 + $0xb8] sm:$0xff] %v422_v44  ;;  %347 = vrot.lane.b32.xlu0 %v304_v13, %s742_s2 }
 0x208   :  { %349 = vrot.lane.b32.xlu1 %v583_v8, %s742_s2  ;;  %447 = vst [vmem:[#allocation8 + $0xb0] sm:$0xff] %v421_v45 }
 0x20b   :  { %335 = vrot.lane.b32.xlu0 %v314_v27, %s743_s21 }
 0x20c   :  { %337 = vrot.lane.b32.xlu1 %v586_v21, %s743_s21 }
 0x20f   :  { %351 = vrot.lane.b32.xlu0 %v314_v27, %s742_s2 }
 0x210   :  { %353 = vrot.lane.b32.xlu1 %v586_v21, %s742_s2 }
 0x265   :  { %v342_v46 = vpop.permute.xlu1 %341  ;;  %v326_v47 = vpop.permute.xlu0 %325 }
 0x266   :  { %v356_v48 = vsub.f32 %v326_v47, %v342_v46 }
 0x268   :  { %v364_v49 = vmul.f32 0.5, %v356_v48 }
 0x269   :  { %v324_v50 = vpop.permute.xlu0 %323  ;;  %v330_v51 = vpop.permute.xlu1 %329 }
 0x26a   :  { %433 = vst [vmem:[#allocation8 + $0x48] sm:$0xff] %v364_v49 }
 0x26d   :  { %v340_v52 = vpop.permute.xlu0 %339  ;;  %v346_v53 = vpop.permute.xlu1 %345 }
 0x26e   :  { %v355_v54 = vsub.f32 %v324_v50, %v340_v52  ;;  %v358_v55 = vsub.f32 %v330_v51, %v346_v53 }
 0x270   :  { %v363_v56 = vmul.f32 0.5, %v355_v54  ;;  %v366_v57 = vmul.f32 0.5, %v358_v55 }
 0x271   :  { %v344_v58 = vpop.permute.xlu0 %343 }
 0x272   :  { %v328_v59 = vpop.permute.xlu1 %327  ;;  %432 = vst [vmem:[#allocation8 + $0x40] sm:$0xff] %v363_v56  ;;  %435 = vst [vmem:[#allocation8 + $0x58] sm:$0xff] %v366_v57 }
 0x273   :  { %v357_v60 = vsub.f32 %v328_v59, %v344_v58 }
 0x275   :  { %v365_v61 = vmul.f32 0.5, %v357_v60  ;;  %v332_v63 = vpop.permute.xlu0 %331 }
 0x276   :  { %v334_v62 = vpop.permute.xlu1 %333 }
 0x277   :  { %434 = vst [vmem:[#allocation8 + $0x50] sm:$0xff] %v365_v61 }
 0x279   :  { %v348_v1 = vpop.permute.xlu0 %347 }
 0x27a   :  { %v350_v0 = vpop.permute.xlu1 %349  ;;  %v359_v3 = vsub.f32 %v332_v63, %v348_v1 }
 0x27b   :  { %v360_v2 = vsub.f32 %v334_v62, %v350_v0 }
 0x27c   :  { %v367_v5 = vmul.f32 0.5, %v359_v3 }
 0x27d   :  { %v368_v4 = vmul.f32 0.5, %v360_v2  ;;  %v336_v7 = vpop.permute.xlu0 %335 }
 0x27e   :  { %v338_v6 = vpop.permute.xlu1 %337  ;;  %436 = vst [vmem:[#allocation8 + $0x60] sm:$0xff] %v367_v5 }
 0x27f   :  { %437 = vst [vmem:[#allocation8 + $0x68] sm:$0xff] %v368_v4 }
 0x281   :  { %v352_v9 = vpop.permute.xlu0 %351 }
 0x282   :  { %v354_v8 = vpop.permute.xlu1 %353  ;;  %v361_v11 = vsub.f32 %v336_v7, %v352_v9 }
 0x283   :  { %v362_v10 = vsub.f32 %v338_v6, %v354_v8 }
 0x284   :  { %v369_v13 = vmul.f32 0.5, %v361_v11 }
 0x285   :  { %v370_v12 = vmul.f32 0.5, %v362_v10 }
 0x286   :  { %438 = vst [vmem:[#allocation8 + $0x70] sm:$0xff] %v369_v13 }
 0x287   :  { %439 = vst [vmem:[#allocation8 + $0x78] sm:$0xff] %v370_v12 }
 0x288   :  { %720 = shalt.err (!%p717_p0)
}
 0x289   :  { %s721_s29 = scalar_lea.hbm %s898_s3, 3072 }
 0x28a   :  { %p722_p1 = scmp.ne.s32.totalorder %s898_s3, %s721_s29  ;;  %p725_p2 = scmp.lt.u32.totalorder %s721_s29, %s898_s3 }
 0x28c   :  { %p727_p3 = pnand %p725_p2, %p722_p1 }
 0x28e   :  { %730 = shalt.err (!%p727_p3)
}
 0x28f   :  { %460 = dma.vmem_to_hbm [thread:$0]  %s455_s23, 3072, %s898_s3, [#allocation4], %s739_s24, %s739_s24, %s740_s25  }
 0x290   :  { %735 = dma.done.wait [#allocation4], 3072  }
 0x291   :  { %736 = vsyncadd [#allocation4], 4294964224 }
 0x292   :  { %464 = vsyncpa [#allocation3], 1 }
 0x293   :  { %465 = vsyncpa [#allocation6], 1 }
 0x294   :  { %466 = vsyncpa [#allocation4], 1 }

</bundles_post_ra>
